<compile_context>
chip_gen: v5e
topology: v5e:2x2
jax: 0.10.0
libtpu: 0.0.40
codegen_flags: <defaults>
</compile_context>

<pallas_src>
import functools
import math

import numpy as np
import jax
import jax.numpy as jnp
from jax import lax
from jax.experimental import pallas as pl
from jax.experimental.pallas import tpu as pltpu


# ----------------------------------------------------------------------------
# Deterministic "parameter" construction (mirrors gaussian()/create_window()).
# ----------------------------------------------------------------------------
def gaussian_1d(window_size: int, sigma: float = 1.5) -> np.ndarray:
    g = np.array(
        [math.exp(-((x - window_size // 2) ** 2) / float(2 * sigma ** 2))
         for x in range(window_size)],
        dtype=np.float64,
    )
    return (g / g.sum()).astype(np.float32)


def create_window_2d(window_size: int) -> np.ndarray:
    g = gaussian_1d(window_size, 1.5)
    return np.outer(g, g).astype(np.float32)  # (K, K); identical per channel


# ----------------------------------------------------------------------------
# Host-side (trace-time) banded Toeplitz matrices so that the separable
# Gaussian "valid" convolution of a plane-group is exactly two matmuls:
#     filtered = BDH @ stacked_maps @ BDW
# ----------------------------------------------------------------------------
def _row_conv_matrix(g: np.ndarray, H: int, HO: int, HOP: int) -> np.ndarray:
    # A[i, h] = g[h - i] for 0 <= h - i < K; rows HO..HOP-1 are zero padding
    # (HOP rounds HO up to a sublane multiple so per-map slices stay aligned).
    K = g.shape[0]
    a = np.zeros((HOP, H), np.float32)
    for i in range(HO):
        a[i, i:i + K] = g
    return a


def _col_conv_matrix(g: np.ndarray, W: int, WO: int) -> np.ndarray:
    # B[w, j] = g[w - j] for 0 <= w - j < K
    K = g.shape[0]
    b = np.zeros((W, WO), np.float32)
    for j in range(WO):
        b[j:j + K, j] = g
    return b


# ----------------------------------------------------------------------------
# Pallas kernel: one plane-group (G planes packed along lanes) per grid step.
# ----------------------------------------------------------------------------
def _ssim_group_kernel(c2_ref, bdh_ref, bdw_ref, x_ref, y_ref,
                       csum_ref, ssum_ref, *, HO, HOP):
    x = x_ref[0]      # (H, G*W) float32, G planes packed along the lane axis
    y = y_ref[0]

    # Squared / cross terms computed once (hoisted), then all 5 maps stacked
    # along sublanes so the whole group's Gaussian filtering is 2 MXU matmuls.
    maps = jnp.concatenate([x, y, x * x, y * y, x * y], axis=0)      # (5H, GW)

    # Separable Gaussian conv on the MXU: row pass, then block-diag column pass.
    t = jnp.dot(bdh_ref[...], maps,
                preferred_element_type=jnp.float32)                  # (5*HOP, GW)
    f = jnp.dot(t, bdw_ref[...],
                preferred_element_type=jnp.float32)                  # (5*HOP, G*WO)

    mu1 = f[0 * HOP:0 * HOP + HO]
    mu2 = f[1 * HOP:1 * HOP + HO]
    s11 = f[2 * HOP:2 * HOP + HO]
    s22 = f[3 * HOP:3 * HOP + HO]
    s12 = f[4 * HOP:4 * HOP + HO]

    sigma1_sq = s11 - mu1 * mu1
    sigma2_sq = s22 - mu2 * mu2
    sigma12 = s12 - mu1 * mu2

    c2 = c2_ref[0]
    # Single sqrt of the product: equal to sqrt(a)*sqrt(b) for a,b >= 0 (the
    # PyTorch reference would NaN for tiny negative variances anyway).
    r12 = jnp.sqrt(sigma1_sq * sigma2_sq)
    contr = (2.0 * r12 + c2) / (sigma1_sq + sigma2_sq + c2)
    si = (sigma12 + c2) / (r12 + c2)

    def _sum2d(v):  # full reduce -> (1, 1) block
        return jnp.sum(jnp.sum(v, axis=1, keepdims=True), axis=0, keepdims=True)

    csum_ref[...] = _sum2d(contr)
    ssum_ref[...] = _sum2d(si)


def _pick_group_size(nc: int, w: int, max_lanes: int = 2048) -> int:
    # Largest divisor of NC whose packed lane width stays VMEM-friendly;
    # at the demo shape this packs all 8 planes -> 128 lanes (full vreg width).
    g = 1
    for cand in range(1, nc + 1):
        if nc % cand == 0 and cand * w <= max_lanes:
            g = cand
    return g


def _ssim_pallas_impl(img1, img2, window_size):
    N, C, H, W = img1.shape
    K = int(window_size)
    HO, WO = H - K + 1, W - K + 1
    assert HO >= 1 and WO >= 1, "window larger than image"
    NC = N * C
    G = _pick_group_size(NC, W)
    GROUPS = NC // G
    HOP = ((HO + 7) // 8) * 8     # sublane-align each map's row block

    # Dynamic range L (same data-dependent rule as the PyTorch reference).
    # TODO(synk): for very large images this extra HBM read of img1 could be
    # folded into the kernel as per-group min/max outputs.
    max_val = jnp.where(jnp.max(img1) > 128, 255.0, 1.0)
    min_val = jnp.where(jnp.min(img1) < -0.5, -1.0, 0.0)
    L = max_val - min_val
    c2 = jnp.reshape(((0.03 * L) ** 2).astype(jnp.float32), (1,))

    g1 = gaussian_1d(K, 1.5)
    bdh = np.kron(np.eye(5, dtype=np.float32),
                  _row_conv_matrix(g1, H, HO, HOP))        # (5*HOP, 5*H)
    bdw = np.kron(np.eye(G, dtype=np.float32),
                  _col_conv_matrix(g1, W, WO))             # (G*W, G*WO)

    # Pack G planes along the lane dimension: (GROUPS, H, G*W).
    def pack(t):
        t = t.reshape(GROUPS, G, H, W).astype(jnp.float32)
        return jnp.transpose(t, (0, 2, 1, 3)).reshape(GROUPS, H, G * W)

    x = pack(img1)
    y = pack(img2)

    kernel = functools.partial(_ssim_group_kernel, HO=HO, HOP=HOP)

    csum, ssum = pl.pallas_call(
        kernel,
        out_shape=(jax.ShapeDtypeStruct((GROUPS, 1), jnp.float32),
                   jax.ShapeDtypeStruct((GROUPS, 1), jnp.float32)),
        grid_spec=pltpu.PrefetchScalarGridSpec(
            num_scalar_prefetch=1,                       # c2 -> SMEM
            grid=(GROUPS,),
            in_specs=[
                pl.BlockSpec((5 * HOP, 5 * H), lambda i, *_: (0, 0)),   # BDH
                pl.BlockSpec((G * W, G * WO), lambda i, *_: (0, 0)),    # BDW
                pl.BlockSpec((1, H, G * W), lambda i, *_: (i, 0, 0)),   # img1 group
                pl.BlockSpec((1, H, G * W), lambda i, *_: (i, 0, 0)),   # img2 group
            ],
            out_specs=(
                pl.BlockSpec((1, 1), lambda i, *_: (i, 0)),   # contr partial sum
                pl.BlockSpec((1, 1), lambda i, *_: (i, 0)),   # si partial sum
            ),
        ),
        compiler_params=pltpu.CompilerParams(
            dimension_semantics=("parallel",)),           # shardable across TCs
    )(c2, jnp.asarray(bdh), jnp.asarray(bdw), x, y)

    count = NC * HO * WO
    res2 = jnp.sum(csum) / count                 # contr.mean()
    res3 = jnp.sum(ssum) / count                 # si.mean()
    return res2 * jnp.sqrt(res3)                 # contr.mean() * si.mean()**0.5


ssim_pallas = jax.jit(_ssim_pallas_impl, static_argnames=("window_size",))


# ----------------------------------------------------------------------------
# Pure-JAX reference (for a correctness sanity check only).
# ----------------------------------------------------------------------------
def _ssim_reference(img1, img2, window_2d, window_size):
    N, C, H, W = img1.shape
    w4 = jnp.broadcast_to(
        jnp.asarray(window_2d, jnp.float32)[None, None],
        (C, 1, window_size, window_size))

    def conv(t):
        return lax.conv_general_dilated(
            t, w4, window_strides=(1, 1), padding="VALID",
            feature_group_count=C,
            dimension_numbers=("NCHW", "OIHW", "NCHW"))

    max_val = jnp.where(jnp.max(img1) > 128, 255.0, 1.0)
    min_val = jnp.where(jnp.min(img1) < -0.5, -1.0, 0.0)
    L = max_val - min_val
    C2 = (0.03 * L) ** 2

    mu1, mu2 = conv(img1), conv(img2)
    mu1_sq, mu2_sq, mu1_mu2 = mu1 * mu1, mu2 * mu2, mu1 * mu2
    sigma1_sq = conv(img1 * img1) - mu1_sq
    sigma2_sq = conv(img2 * img2) - mu2_sq
    sigma12 = conv(img1 * img2) - mu1_mu2

    v2 = sigma1_sq + sigma2_sq + C2
    contr = (2 * sigma1_sq ** 0.5 * sigma2_sq ** 0.5 + C2) / v2
    si = (sigma12 + C2) / (sigma1_sq ** 0.5 * sigma2_sq ** 0.5 + C2)
    return contr.mean() * si.mean() ** 0.5


# ----------------------------------------------------------------------------
if __name__ == "__main__":
    key = jax.random.PRNGKey(0)
    k1, k2 = jax.random.split(key)

    # SSIM(window_size=11) applied to NCHW images (2, 4, 16, 16).
    N, C, H, W = 2, 4, 16, 16
    WINDOW_SIZE = 11

    img1 = jax.random.uniform(k1, (N, C, H, W), dtype=jnp.float32)
    img2 = jax.random.uniform(k2, (N, C, H, W), dtype=jnp.float32)

    out = ssim_pallas(img1, img2, WINDOW_SIZE)
    out = jax.block_until_ready(out)

    window_2d = create_window_2d(WINDOW_SIZE)
    ref = jax.block_until_ready(
        _ssim_reference(img1, img2, window_2d, WINDOW_SIZE))
    np.testing.assert_allclose(np.asarray(out), np.asarray(ref),
                               rtol=2e-3, atol=1e-4)

    print("KERNEL_OK")
</pallas_src>

<mosaic_0001>
module attributes {stable_mosaic.version = 11 : i64} {
  func.func @_ssim_group_kernel(%arg0: i32, %arg1: memref<1xf32, #tpu.memory_space<smem>>, %arg2: memref<40x80xf32, #tpu.memory_space<vmem>>, %arg3: memref<128x48xf32, #tpu.memory_space<vmem>>, %arg4: memref<1x16x128xf32, #tpu.memory_space<vmem>>, %arg5: memref<1x16x128xf32, #tpu.memory_space<vmem>>, %arg6: memref<1x1xf32, #tpu.memory_space<vmem>>, %arg7: memref<1x1xf32, #tpu.memory_space<vmem>>) attributes {dimension_semantics = [#tpu.dimension_semantics<parallel>], iteration_bounds = array<i64: 1>, scalar_prefetch = 1 : i64, scratch_operands = 0 : i64, tpu.core_type = #tpu.core_type<tc>, window_params = [{pipeline_mode = #tpu.pipeline_mode<synchronous>, transform_indices = @transform_0, window_bounds = array<i64: 40, 80>}, {pipeline_mode = #tpu.pipeline_mode<synchronous>, transform_indices = @transform_1, window_bounds = array<i64: 128, 48>}, {transform_indices = @transform_2, window_bounds = array<i64: 1, 16, 128>}, {transform_indices = @transform_3, window_bounds = array<i64: 1, 16, 128>}, {transform_indices = @transform_4, window_bounds = array<i64: 1, 1>}, {transform_indices = @transform_5, window_bounds = array<i64: 1, 1>}]} {
    %c0 = arith.constant 0 : index
    %c0_0 = arith.constant 0 : index
    %c0_1 = arith.constant 0 : index
    %0 = vector.load %arg4[%c0, %c0_0, %c0_1] : memref<1x16x128xf32, #tpu.memory_space<vmem>>, vector<1x16x128xf32>
    %1 = vector.shape_cast %0 : vector<1x16x128xf32> to vector<16x128xf32>
    %c0_2 = arith.constant 0 : index
    %c0_3 = arith.constant 0 : index
    %c0_4 = arith.constant 0 : index
    %2 = vector.load %arg5[%c0_2, %c0_3, %c0_4] : memref<1x16x128xf32, #tpu.memory_space<vmem>>, vector<1x16x128xf32>
    %3 = vector.shape_cast %2 : vector<1x16x128xf32> to vector<16x128xf32>
    %4 = arith.mulf %1, %1 : vector<16x128xf32>
    %5 = arith.mulf %3, %3 : vector<16x128xf32>
    %6 = arith.mulf %1, %3 : vector<16x128xf32>
    %7 = tpu.concatenate %1, %3, %4, %5, %6 in 0 : vector<16x128xf32>, vector<16x128xf32>, vector<16x128xf32>, vector<16x128xf32>, vector<16x128xf32> -> vector<80x128xf32>
    %c0_5 = arith.constant 0 : index
    %c0_6 = arith.constant 0 : index
    %8 = vector.load %arg2[%c0_5, %c0_6] : memref<40x80xf32, #tpu.memory_space<vmem>>, vector<40x80xf32>
    %cst = arith.constant dense<0.000000e+00> : vector<40x128xf32>
    %9 = tpu.matmul %8, %7, %cst {dimension_numbers = #tpu.dot_dimension_numbers<[1], [0], [0], [1], [0, 0, 1, 1], [], []>} : vector<40x80xf32>, vector<80x128xf32>, vector<40x128xf32> -> vector<40x128xf32>
    %c0_7 = arith.constant 0 : index
    %c0_8 = arith.constant 0 : index
    %10 = vector.load %arg3[%c0_7, %c0_8] : memref<128x48xf32, #tpu.memory_space<vmem>>, vector<128x48xf32>
    %cst_9 = arith.constant dense<0.000000e+00> : vector<40x48xf32>
    %11 = tpu.matmul %9, %10, %cst_9 {dimension_numbers = #tpu.dot_dimension_numbers<[1], [0], [0], [1], [0, 0, 1, 1], [], []>} : vector<40x128xf32>, vector<128x48xf32>, vector<40x48xf32> -> vector<40x48xf32>
    %12 = vector.extract_strided_slice %11 {offsets = [0, 0], sizes = [6, 48], strides = [1, 1]} : vector<40x48xf32> to vector<6x48xf32>
    %13 = vector.extract_strided_slice %11 {offsets = [8, 0], sizes = [6, 48], strides = [1, 1]} : vector<40x48xf32> to vector<6x48xf32>
    %14 = vector.extract_strided_slice %11 {offsets = [16, 0], sizes = [6, 48], strides = [1, 1]} : vector<40x48xf32> to vector<6x48xf32>
    %15 = vector.extract_strided_slice %11 {offsets = [24, 0], sizes = [6, 48], strides = [1, 1]} : vector<40x48xf32> to vector<6x48xf32>
    %16 = vector.extract_strided_slice %11 {offsets = [32, 0], sizes = [6, 48], strides = [1, 1]} : vector<40x48xf32> to vector<6x48xf32>
    %17 = arith.mulf %12, %12 : vector<6x48xf32>
    %18 = arith.subf %14, %17 : vector<6x48xf32>
    %19 = arith.mulf %13, %13 : vector<6x48xf32>
    %20 = arith.subf %15, %19 : vector<6x48xf32>
    %21 = arith.mulf %12, %13 : vector<6x48xf32>
    %22 = arith.subf %16, %21 : vector<6x48xf32>
    %c0_10 = arith.constant 0 : index
    %23 = memref.load %arg1[%c0_10] : memref<1xf32, #tpu.memory_space<smem>>
    %24 = arith.mulf %18, %20 : vector<6x48xf32>
    %25 = math.sqrt %24 : vector<6x48xf32>
    %cst_11 = arith.constant 2.000000e+00 : f32
    %26 = vector.broadcast %cst_11 : f32 to vector<6x48xf32>
    %27 = arith.mulf %26, %25 : vector<6x48xf32>
    %28 = vector.broadcast %23 : f32 to vector<6x48xf32>
    %29 = arith.addf %27, %28 : vector<6x48xf32>
    %30 = arith.addf %18, %20 : vector<6x48xf32>
    %31 = vector.broadcast %23 : f32 to vector<6x48xf32>
    %32 = arith.addf %30, %31 : vector<6x48xf32>
    %33 = arith.divf %29, %32 : vector<6x48xf32>
    %34 = vector.broadcast %23 : f32 to vector<6x48xf32>
    %35 = arith.addf %22, %34 : vector<6x48xf32>
    %36 = vector.broadcast %23 : f32 to vector<6x48xf32>
    %37 = arith.addf %25, %36 : vector<6x48xf32>
    %38 = arith.divf %35, %37 : vector<6x48xf32>
    %cst_12 = arith.constant dense<0.000000e+00> : vector<6xf32>
    %39 = vector.multi_reduction <add>, %33, %cst_12 [1] : vector<6x48xf32> to vector<6xf32>
    %40 = vector.shape_cast %39 : vector<6xf32> to vector<6x1xf32>
    %cst_13 = arith.constant dense<0.000000e+00> : vector<1xf32>
    %41 = vector.multi_reduction <add>, %40, %cst_13 [0] : vector<6x1xf32> to vector<1xf32>
    %42 = vector.shape_cast %41 : vector<1xf32> to vector<1x1xf32>
    %c0_14 = arith.constant 0 : index
    %c0_15 = arith.constant 0 : index
    %43 = vector.load %arg6[%c0_14, %c0_15] : memref<1x1xf32, #tpu.memory_space<vmem>>, vector<1x1xf32>
    tpu.vector_store %arg6[%c0_14, %c0_15], %42 {strides = array<i32>} : memref<1x1xf32, #tpu.memory_space<vmem>>, vector<1x1xf32>,
    %cst_16 = arith.constant dense<0.000000e+00> : vector<6xf32>
    %44 = vector.multi_reduction <add>, %38, %cst_16 [1] : vector<6x48xf32> to vector<6xf32>
    %45 = vector.shape_cast %44 : vector<6xf32> to vector<6x1xf32>
    %cst_17 = arith.constant dense<0.000000e+00> : vector<1xf32>
    %46 = vector.multi_reduction <add>, %45, %cst_17 [0] : vector<6x1xf32> to vector<1xf32>
    %47 = vector.shape_cast %46 : vector<1xf32> to vector<1x1xf32>
    %c0_18 = arith.constant 0 : index
    %c0_19 = arith.constant 0 : index
    %48 = vector.load %arg7[%c0_18, %c0_19] : memref<1x1xf32, #tpu.memory_space<vmem>>, vector<1x1xf32>
    tpu.vector_store %arg7[%c0_18, %c0_19], %47 {strides = array<i32>} : memref<1x1xf32, #tpu.memory_space<vmem>>, vector<1x1xf32>,
    return
  }
  func.func @transform_0(%arg0: i32, %arg1: memref<1xf32, #tpu.memory_space<smem>>) -> (i32, i32) {
    %c0_i32 = arith.constant 0 : i32
    %c0_i32_0 = arith.constant 0 : i32
    %c0_i32_1 = arith.constant 0 : i32
    return %c0_i32, %c0_i32_0 : i32, i32
  }
  func.func @transform_1(%arg0: i32, %arg1: memref<1xf32, #tpu.memory_space<smem>>) -> (i32, i32) {
    %c0_i32 = arith.constant 0 : i32
    %c0_i32_0 = arith.constant 0 : i32
    %c0_i32_1 = arith.constant 0 : i32
    return %c0_i32, %c0_i32_0 : i32, i32
  }
  func.func @transform_2(%arg0: i32, %arg1: memref<1xf32, #tpu.memory_space<smem>>) -> (i32, i32, i32) {
    %c0_i32 = arith.constant 0 : i32
    %c0_i32_0 = arith.constant 0 : i32
    %c0_i32_1 = arith.constant 0 : i32
    return %arg0, %c0_i32, %c0_i32_0 : i32, i32, i32
  }
  func.func @transform_3(%arg0: i32, %arg1: memref<1xf32, #tpu.memory_space<smem>>) -> (i32, i32, i32) {
    %c0_i32 = arith.constant 0 : i32
    %c0_i32_0 = arith.constant 0 : i32
    %c0_i32_1 = arith.constant 0 : i32
    return %arg0, %c0_i32, %c0_i32_0 : i32, i32, i32
  }
  func.func @transform_4(%arg0: i32, %arg1: memref<1xf32, #tpu.memory_space<smem>>) -> (i32, i32) {
    %c0_i32 = arith.constant 0 : i32
    %c0_i32_0 = arith.constant 0 : i32
    return %arg0, %c0_i32 : i32, i32
  }
  func.func @transform_5(%arg0: i32, %arg1: memref<1xf32, #tpu.memory_space<smem>>) -> (i32, i32) {
    %c0_i32 = arith.constant 0 : i32
    %c0_i32_0 = arith.constant 0 : i32
    return %arg0, %c0_i32 : i32, i32
  }
}

</mosaic_0001>

<bundles_post_ra>
// kernel: _ssim_pallas_impl.1
= control target key start
LH: loop header
LB: loop body
LE: loop exit
PB: predicated region body
PF: predicated region fallthrough
CT: control target
= control target key end

     0   :  { %13 = vsyncpa [#allocation5], 0  ;;  %s471_s0 = inlined_call_operand.<no memory space> [shape: f32[1], index: 0, kind: input, shape index: {}]   ;;  %s472_s1 = inlined_call_operand.vmem [shape: f32[40,80], index: 1, kind: input, shape index: {}]   ;;  %s473_s2 = inlined_call_operand.vmem [shape: f32[128,48], index: 2, kind: input, shape index: {}]   ;;  %s474_s3 = inlined_call_operand.vmem [shape: f32[1,16,128], index: 3, kind: input, shape index: {}]   ;;  %s475_s4 = inlined_call_operand.vmem [shape: f32[1,16,128], index: 4, kind: input, shape index: {}]   ;;  %s476_s5 = inlined_call_operand.hbm [shape: f32[1,1], index: 5, kind: output, shape index: {0}]   ;;  %s477_s6 = inlined_call_operand.hbm [shape: f32[1,1], index: 6, kind: output, shape index: {1}]  }
   0x1   :  { %v24_v0 = vld [vmem:[%s474_s3 + $0x8] sm:$0xff]  ;;  %v23_v2 = vld [vmem:[%s474_s3] sm:$0xff] }
   0x2   :  { %v26_v1 = vld [vmem:[%s475_s4 + $0x8] sm:$0xff]  ;;  %v25_v4 = vld [vmem:[%s475_s4] sm:$0xff] }
   0x3   :  { %v32_v3 = vmul.f32 %v26_v1, %v24_v0  ;;  %v31_v5 = vmul.f32 %v25_v4, %v23_v2 }
   0x4   :  { %14 = vsyncpa [#allocation7], 0  ;;  %v30_v6 = vmul.f32 %v26_v1, %v26_v1  ;;  %v29_v7 = vmul.f32 %v25_v4, %v25_v4  ;;  %v28_v8 = vmul.f32 %v24_v0, %v24_v0  ;;  %v27_v9 = vmul.f32 %v23_v2, %v23_v2  ;;  %v101_v10 = vld [vmem:[%s473_s2 + $0x78] sm:$0xff]  ;;  %v100_v11 = vld [vmem:[%s473_s2 + $0x70] sm:$0xff]  ;;  %s223_s22 = sshll.u32 %s476_s5, 4  ;;  %s340_s23 = smov [#allocation6]   ;;  %s224_s22 = int_to_ptr.hbm [resolvable:$true] %s223_s22 }
   0x5   :  { %60 = vmatpush.msra.mxu0 %v32_v3  ;;  %253 = vmatpush.msra.mxu3 %v32_v3  ;;  %v99_v12 = vld [vmem:[%s473_s2 + $0x68] sm:$0xff]  ;;  %v33_v13 = vld [vmem:[%s472_s1] sm:$0xff]  ;;  %vm38_vm0 = vcmask 654336   ;;  %v97_v16 = vld [vmem:[%s473_s2 + $0x58] sm:$0xff]  ;;  %v155_v44 = vstv %s471_s0  ;;  %vm191_vm7 = vcmask 390144   ;;  %vm195_vm12 = vcmask 1045504  }
   0x6   :  { %102 = vmatpush.msra.mxu1 %v101_v10  ;;  %263 = vmatpush.msra.mxu2 %v101_v10  ;;  %v34_v14 = vld [vmem:[%s472_s1 + $0x8] sm:$0xff]  ;;  %v98_v15 = vld [vmem:[%s473_s2 + $0x60] sm:$0xff]  ;;  %v96_v17 = vld [vmem:[%s473_s2 + $0x50] sm:$0xff]  ;;  %s339_s0 = smov [#allocation4]   ;;  %vm203_vm13 = vcmask 0   ;;  %s232_s24 = sshll.u32 %s340_s23, 4  ;;  %s233_s24 = int_to_ptr.vmem [resolvable:$true] %s232_s24 }
   0x7   :  { %61 = vmatpush.msra.mxu0 %v31_v5  ;;  %254 = vmatpush.msra.mxu3 %v31_v5  ;;  %v95_v18 = vld [vmem:[%s473_s2 + $0x48] sm:$0xff]  ;;  %v35_v19 = vld [vmem:[%s472_s1 + $0x10] sm:$0xff]  ;;  %v94_v20 = vld [vmem:[%s473_s2 + $0x40] sm:$0xff]  ;;  %s221_s19 = sshll.u32 %s339_s0, 4  ;;  %s234_s5 = sshll.u32 %s477_s6, 4  ;;  %s222_s19 = int_to_ptr.vmem [resolvable:$true] %s221_s19  ;;  %s235_s5 = int_to_ptr.hbm [resolvable:$true] %s234_s5 }
   0x8   :  { %103 = vmatpush.msra.mxu1 %v100_v11  ;;  %264 = vmatpush.msra.mxu2 %v100_v11  ;;  %v93_v21 = vld [vmem:[%s473_s2 + $0x38] sm:$0xff]  ;;  %v92_v22 = vld [vmem:[%s473_s2 + $0x30] sm:$0xff]  ;;  %v91_v23 = vld [vmem:[%s473_s2 + $0x28] sm:$0xff] }
   0x9   :  { %62 = vmatpush.msra.mxu0 %v30_v6  ;;  %255 = vmatpush.msra.mxu3 %v30_v6  ;;  %v36_v24 = vld [vmem:[%s472_s1 + $0x18] sm:$0xff]  ;;  %v90_v25 = vld [vmem:[%s473_s2 + $0x20] sm:$0xff]  ;;  %v88_v27 = vld [vmem:[%s473_s2 + $0x10] sm:$0xff] }
   0xa   :  { %104 = vmatpush.msra.mxu1 %v99_v12  ;;  %265 = vmatpush.msra.mxu2 %v99_v12  ;;  %v89_v26 = vld [vmem:[%s473_s2 + $0x18] sm:$0xff]  ;;  %v87_v28 = vld [vmem:[%s473_s2 + $0x8] sm:$0xff]  ;;  %v37_v29 = vld [vmem:[%s472_s1 + $0x20] sm:$0xff] }
   0xb   :  { %63 = vmatpush.msra.mxu0 %v29_v7  ;;  %256 = vmatpush.msra.mxu3 %v29_v7  ;;  %v86_v30 = vld [vmem:[%s473_s2] sm:$0xff] }
   0xc   :  { %105 = vmatpush.msra.mxu1 %v98_v15  ;;  %266 = vmatpush.msra.mxu2 %v98_v15 }
   0xd   :  { %64 = vmatpush.msra.mxu0 %v28_v8  ;;  %257 = vmatpush.msra.mxu3 %v28_v8 }
   0xe   :  { %106 = vmatpush.msra.mxu1 %v97_v16  ;;  %267 = vmatpush.msra.mxu2 %v97_v16 }
   0xf   :  { %65 = vmatpush.msra.mxu0 %v27_v9  ;;  %258 = vmatpush.msra.mxu3 %v27_v9 }
  0x10   :  { %107 = vmatpush.msra.mxu1 %v96_v17  ;;  %268 = vmatpush.msra.mxu2 %v96_v17 }
  0x11   :  { %66 = vmatpush.msra.mxu0 %v26_v1  ;;  %259 = vmatpush.msra.mxu3 %v26_v1 }
  0x12   :  { %108 = vmatpush.msra.mxu1 %v95_v18  ;;  %269 = vmatpush.msra.mxu2 %v95_v18 }
  0x13   :  { %67 = vmatpush.msra.mxu0 %v25_v4  ;;  %260 = vmatpush.msra.mxu3 %v25_v4 }
  0x14   :  { %109 = vmatpush.msra.mxu1 %v94_v20  ;;  %270 = vmatpush.msra.mxu2 %v94_v20 }
  0x15   :  { %68 = vmatpush.msra.mxu0 %v24_v0  ;;  %261 = vmatpush.msra.mxu3 %v24_v0 }
  0x16   :  { %110 = vmatpush.msra.mxu1 %v93_v21  ;;  %271 = vmatpush.msra.mxu2 %v93_v21 }
  0x17   :  { %69 = vmatpush.msra.mxu0 %v23_v2  ;;  %262 = vmatpush.msra.mxu3 %v23_v2 }
  0x18   :  { %248 = vmatmul.msk.f32.vlgmr.msra.gmra.mxu0 %vm38_vm0, %v33_v13  ;;  %249 = vmatmul.msk.f32.vlgmr.msra.gmra.mxu3 %vm38_vm0, %v34_v14 }
  0x19   :  { %111 = vmatpush.msra.mxu1 %v92_v22  ;;  %272 = vmatpush.msra.mxu2 %v92_v22 }
  0x1b   :  { %112 = vmatpush.msra.mxu1 %v91_v23  ;;  %273 = vmatpush.msra.mxu2 %v91_v23 }
  0x1d   :  { %113 = vmatpush.msra.mxu1 %v90_v25  ;;  %274 = vmatpush.msra.mxu2 %v90_v25 }
  0x1f   :  { %114 = vmatpush.msra.mxu1 %v89_v26  ;;  %275 = vmatpush.msra.mxu2 %v89_v26 }
  0x20   :  { %250 = vmatmul.msk.f32.gmra.mxu3 %vm38_vm0, %v35_v19 }
  0x21   :  { %115 = vmatpush.msra.mxu1 %v88_v27  ;;  %276 = vmatpush.msra.mxu2 %v88_v27 }
  0x23   :  { %116 = vmatpush.msra.mxu1 %v87_v28  ;;  %277 = vmatpush.msra.mxu2 %v87_v28 }
  0x25   :  { %117 = vmatpush.msra.mxu1 %v86_v30  ;;  %278 = vmatpush.msra.mxu2 %v86_v30 }
  0x28   :  { %251 = vmatmul.msk.f32.gmra.mxu3 %vm38_vm0, %v36_v24 }
  0x30   :  { %252 = vmatmul.msk.f32.gmra.mxu3 %vm38_vm0, %v37_v29 }
  0x95   :  { %v71_v31 = vpop.f32.mrf.mxu0 }
  0x96   :  { %118 = vmatmul.f32.vlgmr.msra.gmra.mxu1 %v71_v31 }
  0x9b   :  { %v74_v32 = vpop.f32.mrf.mxu3 }
  0x9e   :  { %121 = vmatmul.f32.gmra.mxu1 %v74_v32 }
  0xa3   :  { %v77_v33 = vpop.f32.mrf.mxu3 }
  0xa4   :  { %124 = vmatmul.f32.vlgmr.msra.gmra.mxu2 %v77_v33 }
  0xab   :  { %v80_v34 = vpop.f32.mrf.mxu3 }
  0xac   :  { %127 = vmatmul.f32.gmra.mxu2 %v80_v34 }
  0xb3   :  { %v83_v35 = vpop.f32.mrf.mxu3 }
  0xb4   :  { %130 = vmatmul.f32.gmra.mxu2 %v83_v35 }
 0x113   :  { %v119_v36 = vpop.f32.mrf.mxu1 }
 0x114   :  { %v134_v39 = vmul.f32 %v119_v36, %v119_v36 }
 0x11b   :  { %v122_v38 = vpop.f32.mrf.mxu1 }
 0x11c   :  { %v136_v40 = vmul.f32 %v122_v38, %v122_v38  ;;  %v138_v12 = vmul.f32 %v122_v38, %v119_v36 }
 0x127   :  { %v125_v37 = vpop.f32.mrf.mxu2 }
 0x128   :  { %v135_v42 = vsub.f32 %v125_v37, %v134_v39 }
 0x12f   :  { %v128_v41 = vpop.f32.mrf.mxu2 }
 0x130   :  { %v137_v43 = vsub.f32 %v128_v41, %v136_v40 }
 0x132   :  { %v141_v45 = vmul.f32 %v137_v43, %v135_v42  ;;  %v157_v46 = vadd.f32 %v137_v43, %v135_v42 }
 0x134   :  { %281 = vrsqrt.f32 %v141_v45  ;;  %v158_v47 = vadd.f32 %v157_v46, %v155_v44  ;;  %vm149_vm2 = vcmp.eq.f32.partialorder %v141_v45, inf  ;;  %v152_v60 = vand.u32 2147483648, %v141_v45 }
 0x135   :  { %vm151_vm3 = vcmp.eq.f32.partialorder %v141_v45, 0.0 }
 0x136   :  { %283 = vrcp.f32 %v158_v47  ;;  %v170_v61 = vand.u32 2147483648, %v158_v47  ;;  %vm164_vm4 = vweird.f32 %v158_v47  ;;  %v168_v63 = vand.u32 2147483647, %v158_v47 }
 0x137   :  { %v131_v11 = vpop.f32.mrf.mxu2 }
 0x138   :  { %v171_v4 = vor.u32 1.1754944e-38, %v170_v61  ;;  %vm169_vm6 = vcmp.eq.f32.partialorder %v168_v63, 8.507059e+37  ;;  %v139_v15 = vsub.f32 %v131_v11, %v138_v12 }
 0x13a   :  { %v282_v48 = vpop.eup %281  ;;  %v174_v20 = vadd.f32 %v155_v44, %v139_v15 }
 0x13b   :  { %v143_v49 = vmul.f32 %v282_v48, %v141_v45 }
 0x13c   :  { %v284_v50 = vpop.eup %283 }
 0x13d   :  { %v144_v51 = vmul.f32 %v282_v48, %v143_v49  ;;  %v160_v52 = vmul.f32 %v284_v50, %v158_v47  ;;  %vm165_vm1 = vweird.f32 %v284_v50 }
 0x13e   :  { %vm166_vm5 = vmor %vm164_vm4, %vm165_vm1 }
 0x13f   :  { %v145_v53 = vmul.f32 0.5, %v144_v51  ;;  %v161_v54 = vsub.f32 1.0, %v160_v52 }
 0x141   :  { %v146_v55 = vsub.f32 1.5, %v145_v53  ;;  %v162_v56 = vmul.f32 %v284_v50, %v161_v54 }
 0x143   :  { %v147_v57 = vmul.f32 %v282_v48, %v146_v55  ;;  %v163_v59 = vadd.f32 %v284_v50, %v162_v56 }
 0x145   :  { %v148_v58 = vmul.f32 %v147_v57, %v141_v45  ;;  %v167_v2 = vsel %vm166_vm5, %v284_v50, %v163_v59 }
 0x146   :  { %v172_v6 = vsel %vm169_vm6, %v171_v4, %v167_v2 }
 0x147   :  { %v150_v62 = vsel %vm149_vm2, %v141_v45, %v148_v58 }
 0x148   :  { %v153_v0 = vsel %vm151_vm3, %v152_v60, %v150_v62 }
 0x149   :  { %v154_v1 = vmul.f32 2.0, %v153_v0  ;;  %v175_v3 = vadd.f32 %v155_v44, %v153_v0 }
 0x14b   :  { %v156_v5 = vadd.f32 %v155_v44, %v154_v1  ;;  %285 = vrcp.f32 %v175_v3  ;;  %v187_v14 = vand.u32 2147483648, %v175_v3  ;;  %v185_v17 = vand.u32 2147483647, %v175_v3 }
 0x14c   :  { %vm181_vm9 = vweird.f32 %v175_v3 }
 0x14d   :  { %v173_v7 = vmul.f32 %v172_v6, %v156_v5  ;;  %v188_v19 = vor.u32 1.1754944e-38, %v187_v14  ;;  %vm186_vm11 = vcmp.eq.f32.partialorder %v185_v17, 8.507059e+37 }
 0x14f   :  { %v192_v8 = vsel %vm191_vm7, %v173_v7, 0.0 }
 0x150   :  { %193 = vadd.xlane.f32.xlu0 %v192_v8 }
 0x151   :  { %v286_v9 = vpop.eup %285 }
 0x152   :  { %v177_v10 = vmul.f32 %v286_v9, %v175_v3  ;;  %vm182_vm8 = vweird.f32 %v286_v9 }
 0x153   :  { %vm183_vm10 = vmor %vm181_vm9, %vm182_vm8 }
 0x154   :  { %v178_v13 = vsub.f32 1.0, %v177_v10 }
 0x156   :  { %v179_v16 = vmul.f32 %v286_v9, %v178_v13 }
 0x158   :  { %v180_v18 = vadd.f32 %v286_v9, %v179_v16 }
 0x15a   :  { %v184_v21 = vsel %vm183_vm10, %v286_v9, %v180_v18 }
 0x15b   :  { %v189_v22 = vsel %vm186_vm11, %v188_v19, %v184_v21 }
 0x15c   :  { %v190_v23 = vmul.f32 %v189_v22, %v174_v20 }
 0x15e   :  { %v205_v24 = vsel %vm191_vm7, %v190_v23, 0.0 }
 0x15f   :  { %206 = vadd.xlane.f32.xlu0 %v205_v24 }
 0x1c3   :  { %v194_v25 = vpop.xlane.xlu0 %193 }
 0x1c4   :  { %v196_v26 = vsel %vm195_vm12, %v194_v25, 0.0 }
 0x1c5   :  { %v197_v27 = vrot.slane %v196_v26, 4 }
 0x1c7   :  { %v198_v28 = vadd.f32 %v197_v27, %v196_v26 }
 0x1c9   :  { %v199_v29 = vrot.slane %v198_v28, 2 }
 0x1cb   :  { %v200_v30 = vadd.f32 %v199_v29, %v198_v28 }
 0x1cd   :  { %v201_v31 = vrot.slane %v200_v30, 1 }
 0x1cf   :  { %v202_v32 = vadd.f32 %v201_v31, %v200_v30 }
 0x1d1   :  { %204 = vst.msk [vmem:[#allocation4] sm:$0x1] %vm203_vm13, %v202_v32 }
 0x1d2   :  { %v207_v33 = vpop.xlane.xlu0 %206  ;;  %226 = dma.vmem_to_hbm [thread:$0]  %s222_s19, 16, %s224_s22, [#allocation5]  }
 0x1d3   :  { %v208_v34 = vsel %vm195_vm12, %v207_v33, 0.0 }
 0x1d4   :  { %v209_v35 = vrot.slane %v208_v34, 4 }
 0x1d6   :  { %v210_v36 = vadd.f32 %v209_v35, %v208_v34 }
 0x1d8   :  { %v211_v37 = vrot.slane %v210_v36, 2 }
 0x1da   :  { %v212_v38 = vadd.f32 %v211_v37, %v210_v36 }
 0x1dc   :  { %v213_v39 = vrot.slane %v212_v38, 1 }
 0x1de   :  { %v214_v40 = vadd.f32 %v213_v39, %v212_v38 }
 0x1e0   :  { %215 = vst.msk [vmem:[#allocation6] sm:$0x1] %vm203_vm13, %v214_v40 }
 0x1e1   :  { %237 = dma.vmem_to_hbm [thread:$0]  %s233_s24, 16, %s235_s5, [#allocation7]  }
 0x1e2   :  { %335 = dma.done.wait [#allocation5], 16  }
 0x1e3   :  { %336 = vsyncadd [#allocation5], 4294967280 }
 0x1e4   :  { %337 = dma.done.wait [#allocation7], 16  }
 0x1e5   :  { %338 = vsyncadd [#allocation7], 4294967280 }
 0x1e6   :  { %246 = vsyncpa [#allocation5], 1 }
 0x1e7   :  { %247 = vsyncpa [#allocation7], 1 }

</bundles_post_ra>
